<compile_context>
chip_gen: v6e
topology: v6e:2x2x1
jax: 0.10.0
libtpu: 0.0.40
codegen_flags: <defaults>
</compile_context>

<pallas_src>
import numpy as np
import jax
import jax.numpy as jnp
from jax import lax
from jax.experimental import pallas as pl
from jax.experimental.pallas import tpu as pltpu


# -----------------------------------------------------------------------------
# Fused kernel: 3x3 conv (1 banded matmul) + bias + ReLU + fused 1x1 heads
# -----------------------------------------------------------------------------
def _multitask_kernel(x_ref, wbb_ref, bb_ref, wh_ref, bh_ref, out_ref):
    # x_ref   : (M, Kp)            bf16  vertical-im2col rows (M = N*H),
    #                                    K = 3*(W+2)*C_in zero-padded to Kp lanes
    # wbb_ref : (Kp, W*C_mid)      bf16  banded backbone weight (3 taps fused on K)
    # bb_ref  : (1,  W*C_mid)      f32   backbone bias tiled over w
    # wh_ref  : (W*C_mid, W*C_pad) bf16  block-diagonal fused head weight
    # bh_ref  : (1,  W*C_pad)      f32   fused head bias tiled over w
    # out_ref : (M,  W*C_pad)      f32   lane-dense fused task output
    #
    # Backbone 3x3 conv: a single MXU matmul (all vertical/horizontal taps and
    # the channel contraction live on K), f32 accumulation, then bias + ReLU.
    acc = jnp.dot(x_ref[...], wbb_ref[...], preferred_element_type=jnp.float32)
    feat = jnp.maximum(acc + bb_ref[...], 0.0)               # (M, W*C_mid) f32

    # Fused task heads (1x1 convs): one lane-dense bf16 matmul, f32 accumulate.
    out = jnp.dot(feat.astype(jnp.bfloat16), wh_ref[...],
                  preferred_element_type=jnp.float32) + bh_ref[...]
    out_ref[...] = out.astype(out_ref.dtype)


# -----------------------------------------------------------------------------
# One-time weight repacking (off the critical path; done eagerly with numpy)
# -----------------------------------------------------------------------------
def _build_banded_backbone(w_oihw, W, Kp):
    """(C_mid, C_in, 3, 3) conv weight -> (Kp, W*C_mid) banded f32 matrix.

    Row index = dy*(W+2)*C_in + (w+dx)*C_in + c_in, matching the host-side
    vertical-im2col layout; rows >= 3*(W+2)*C_in stay zero (lane padding)."""
    C_mid, C_in = int(w_oihw.shape[0]), int(w_oihw.shape[1])
    w_hwio = np.transpose(np.asarray(w_oihw, np.float32), (2, 3, 1, 0))
    Wp = W + 2
    wbb = np.zeros((Kp, W * C_mid), np.float32)
    for dy in range(3):
        for w in range(W):
            for dx in range(3):
                r0 = dy * Wp * C_in + (w + dx) * C_in
                wbb[r0:r0 + C_in, w * C_mid:(w + 1) * C_mid] = w_hwio[dy, dx]
    return wbb


def _build_fused_heads(w_seg, b_seg, w_dep, b_dep, W, C_pad):
    """Concatenate + zero-pad the 1x1 heads to C_pad channels and expand to a
    block-diagonal (W*C_mid, W*C_pad) matrix so the output is lane-dense."""
    C_seg, C_mid = int(w_seg.shape[0]), int(w_seg.shape[1])
    C_dep = int(w_dep.shape[0])
    wcomb = np.zeros((C_mid, C_pad), np.float32)
    wcomb[:, :C_seg] = np.asarray(w_seg, np.float32)[:, :, 0, 0].T
    wcomb[:, C_seg:C_seg + C_dep] = np.asarray(w_dep, np.float32)[:, :, 0, 0].T
    bcomb = np.zeros((C_pad,), np.float32)
    bcomb[:C_seg] = np.asarray(b_seg, np.float32)
    bcomb[C_seg:C_seg + C_dep] = np.asarray(b_dep, np.float32)
    wh = np.kron(np.eye(W, dtype=np.float32), wcomb)          # (W*C_mid, W*C_pad)
    bh = np.tile(bcomb, W)[None, :]                           # (1, W*C_pad)
    return wh, bh


# -----------------------------------------------------------------------------
# Forward pass
# -----------------------------------------------------------------------------
def multitask_forward(x_nchw, params):
    """x_nchw: (N, C_in, H, W) f32.  Returns {'segmentation','depth'} in NCHW."""
    N, C_in, H, W = x_nchw.shape
    C_mid = int(params["w_backbone"].shape[0])
    C_seg = int(params["w_seg"].shape[0])
    C_dep = int(params["w_dep"].shape[0])
    C_total = C_seg + C_dep
    Wp = W + 2

    # Pad fused head channels so the output lane dim W*C_pad is a 128-multiple.
    C_pad = C_total
    while (W * C_pad) % 128 != 0:
        C_pad += 1

    K = 3 * Wp * C_in                       # 216 for the demo shape
    Kp = ((K + 127) // 128) * 128           # lane-pad contraction dim (256)
    M = N * H                               # whole batch stacked on matmul M

    # ---- host glue: zero-padded NHWC + vertical im2col (3x on a tiny stream) ----
    x = jnp.transpose(x_nchw, (0, 2, 3, 1))                   # (N, H, W, C_in)
    xp = jnp.pad(x, ((0, 0), (1, 1), (1, 1), (0, 0)))         # (N, H+2, W+2, C_in)
    x_rows = jnp.stack([xp[:, dy:dy + H] for dy in range(3)], axis=2)
    x_slab = x_rows.reshape(M, K)                              # (M, 3*Wp*C_in)
    x_slab = jnp.pad(x_slab, ((0, 0), (0, Kp - K))).astype(jnp.bfloat16)

    # ---- weight repacking (would be cached at model-load time in practice) ---
    wbb = jnp.asarray(_build_banded_backbone(params["w_backbone"], W, Kp),
                      dtype=jnp.bfloat16)                      # (Kp, W*C_mid)
    bb = jnp.tile(params["b_backbone"].astype(jnp.float32), W)[None, :]
    wh_np, bh_np = _build_fused_heads(params["w_seg"], params["b_seg"],
                                      params["w_dep"], params["b_dep"],
                                      W, C_pad)
    wh = jnp.asarray(wh_np, jnp.bfloat16)                      # (W*C_mid, W*C_pad)
    bh = jnp.asarray(bh_np, jnp.float32)                       # (1, W*C_pad)

    flops = 2 * M * Kp * (W * C_mid) + 2 * M * (W * C_mid) * (W * C_pad)
    bytes_accessed = (x_slab.size * 2 + wbb.size * 2 + wh.size * 2
                      + bb.size * 4 + bh.size * 4 + M * W * C_pad * 4)

    # TODO(synk): for large N*H or large W, tile the grid over M blocks (and/or
    # over banded columns of wbb, which grows O(W^2)) and set vmem_limit_bytes
    # explicitly; at this size everything fits in <0.5 MiB of VMEM.
    out_flat = pl.pallas_call(
        _multitask_kernel,
        out_shape=jax.ShapeDtypeStruct((M, W * C_pad), jnp.float32),
        grid_spec=pltpu.PrefetchScalarGridSpec(
            num_scalar_prefetch=0,
            grid=(1,),   # single step: whole batch per invocation
            in_specs=[
                pl.BlockSpec((M, Kp), lambda i: (0, 0)),
                pl.BlockSpec((Kp, W * C_mid), lambda i: (0, 0)),
                pl.BlockSpec((1, W * C_mid), lambda i: (0, 0)),
                pl.BlockSpec((W * C_mid, W * C_pad), lambda i: (0, 0)),
                pl.BlockSpec((1, W * C_pad), lambda i: (0, 0)),
            ],
            out_specs=pl.BlockSpec((M, W * C_pad), lambda i: (0, 0)),
        ),
        compiler_params=pltpu.CompilerParams(
            dimension_semantics=("arbitrary",)),
        cost_estimate=pl.CostEstimate(flops=flops, transcendentals=0,
                                      bytes_accessed=bytes_accessed),
    )(x_slab, wbb, bb, wh, bh)

    # ---- host glue: split fused channels, back to NCHW (PyTorch layout) ----
    out4 = out_flat.reshape(N, H, W, C_pad)
    seg = jnp.transpose(out4[..., :C_seg], (0, 3, 1, 2))
    dep = jnp.transpose(out4[..., C_seg:C_seg + C_dep], (0, 3, 1, 2))
    return {"segmentation": seg, "depth": dep}


# -----------------------------------------------------------------------------
# Pure-JAX reference (mirrors the kernel's bf16 rounding of inputs, backbone
# weights, post-ReLU features and head weights, so the comparison only sees
# accumulation-order differences)
# -----------------------------------------------------------------------------
def reference_forward(x_nchw, params):
    N, C_in, H, W = x_nchw.shape
    C_mid = int(params["w_backbone"].shape[0])

    x = jnp.transpose(x_nchw, (0, 2, 3, 1))
    x = x.astype(jnp.bfloat16).astype(jnp.float32)
    w_hwio = jnp.transpose(params["w_backbone"], (2, 3, 1, 0))
    w_hwio = w_hwio.astype(jnp.bfloat16).astype(jnp.float32)

    xp = jnp.pad(x, ((0, 0), (1, 1), (1, 1), (0, 0)))
    feat = jnp.zeros((N, H, W, C_mid), jnp.float32) + params["b_backbone"]
    for dy in range(3):
        for dx in range(3):
            feat = feat + jnp.einsum(
                "nhwc,cm->nhwm", xp[:, dy:dy + H, dx:dx + W, :], w_hwio[dy, dx],
                precision=lax.Precision.HIGHEST)
    feat = jnp.maximum(feat, 0.0)
    feat = feat.astype(jnp.bfloat16).astype(jnp.float32)   # mirror bf16 head feed

    wseg = params["w_seg"][:, :, 0, 0].T.astype(jnp.bfloat16).astype(jnp.float32)
    wdep = params["w_dep"][:, :, 0, 0].T.astype(jnp.bfloat16).astype(jnp.float32)
    seg = jnp.einsum("nhwm,ms->nhws", feat, wseg,
                     precision=lax.Precision.HIGHEST) + params["b_seg"]
    dep = jnp.einsum("nhwm,md->nhwd", feat, wdep,
                     precision=lax.Precision.HIGHEST) + params["b_dep"]
    return {"segmentation": jnp.transpose(seg, (0, 3, 1, 2)),
            "depth": jnp.transpose(dep, (0, 3, 1, 2))}


if __name__ == "__main__":
    # Small, deterministic configuration.
    N, C_in, H, W = 2, 4, 16, 16
    C_mid, C_seg, C_dep = 8, 3, 1

    key = jax.random.PRNGKey(0)
    kx, k1, k2, k3, k4, k5, k6 = jax.random.split(key, 7)

    x = jax.random.normal(kx, (N, C_in, H, W), dtype=jnp.float32)

    # Parameters in PyTorch Conv2d layout: weight (C_out, C_in, kh, kw).
    params = {
        "w_backbone": 0.1 * jax.random.normal(k1, (C_mid, C_in, 3, 3), jnp.float32),
        "b_backbone": 0.1 * jax.random.normal(k2, (C_mid,), jnp.float32),
        "w_seg": 0.1 * jax.random.normal(k3, (C_seg, C_mid, 1, 1), jnp.float32),
        "b_seg": 0.1 * jax.random.normal(k4, (C_seg,), jnp.float32),
        "w_dep": 0.1 * jax.random.normal(k5, (C_dep, C_mid, 1, 1), jnp.float32),
        "b_dep": 0.1 * jax.random.normal(k6, (C_dep,), jnp.float32),
    }

    out = multitask_forward(x, params)
    out = {k: jax.block_until_ready(v) for k, v in out.items()}

    ref = reference_forward(x, params)
    for task in ("segmentation", "depth"):
        assert out[task].shape == ref[task].shape, task
        assert jnp.allclose(out[task], ref[task], atol=5e-3, rtol=5e-3), task

    print("KERNEL_OK")
</pallas_src>

<mosaic_0001>
module attributes {stable_mosaic.version = 11 : i64} {
  func.func @_multitask_kernel(%arg0: i32, %arg1: memref<32x256xbf16, #tpu.memory_space<vmem>>, %arg2: memref<256x128xbf16, #tpu.memory_space<vmem>>, %arg3: memref<1x128xf32, #tpu.memory_space<vmem>>, %arg4: memref<128x128xbf16, #tpu.memory_space<vmem>>, %arg5: memref<1x128xf32, #tpu.memory_space<vmem>>, %arg6: memref<32x128xf32, #tpu.memory_space<vmem>>) attributes {dimension_semantics = [#tpu.dimension_semantics<arbitrary>], iteration_bounds = array<i64: 1>, scalar_prefetch = 0 : i64, scratch_operands = 0 : i64, tpu.core_type = #tpu.core_type<tc>, window_params = [{pipeline_mode = #tpu.pipeline_mode<synchronous>, transform_indices = @transform_0, window_bounds = array<i64: 32, 256>}, {pipeline_mode = #tpu.pipeline_mode<synchronous>, transform_indices = @transform_1, window_bounds = array<i64: 256, 128>}, {pipeline_mode = #tpu.pipeline_mode<synchronous>, transform_indices = @transform_2, window_bounds = array<i64: 1, 128>}, {pipeline_mode = #tpu.pipeline_mode<synchronous>, transform_indices = @transform_3, window_bounds = array<i64: 128, 128>}, {pipeline_mode = #tpu.pipeline_mode<synchronous>, transform_indices = @transform_4, window_bounds = array<i64: 1, 128>}, {pipeline_mode = #tpu.pipeline_mode<synchronous>, transform_indices = @transform_5, window_bounds = array<i64: 32, 128>}]} {
    %c0 = arith.constant 0 : index
    %c0_0 = arith.constant 0 : index
    %0 = vector.load %arg1[%c0, %c0_0] : memref<32x256xbf16, #tpu.memory_space<vmem>>, vector<32x256xbf16>
    %c0_1 = arith.constant 0 : index
    %c0_2 = arith.constant 0 : index
    %1 = vector.load %arg2[%c0_1, %c0_2] : memref<256x128xbf16, #tpu.memory_space<vmem>>, vector<256x128xbf16>
    %cst = arith.constant dense<0.000000e+00> : vector<32x128xf32>
    %2 = tpu.matmul %0, %1, %cst {dimension_numbers = #tpu.dot_dimension_numbers<[1], [0], [0], [1], [0, 0, 1, 1], [], []>} : vector<32x256xbf16>, vector<256x128xbf16>, vector<32x128xf32> -> vector<32x128xf32>
    %c0_3 = arith.constant 0 : index
    %c0_4 = arith.constant 0 : index
    %3 = vector.load %arg3[%c0_3, %c0_4] : memref<1x128xf32, #tpu.memory_space<vmem>>, vector<1x128xf32>
    %4 = vector.broadcast %3 : vector<1x128xf32> to vector<32x128xf32>
    %5 = arith.addf %2, %4 : vector<32x128xf32>
    %cst_5 = arith.constant 0.000000e+00 : f32
    %6 = vector.broadcast %cst_5 : f32 to vector<32x128xf32>
    %7 = arith.maximumf %5, %6 : vector<32x128xf32>
    %8 = arith.truncf %7 : vector<32x128xf32> to vector<32x128xbf16>
    %c0_6 = arith.constant 0 : index
    %c0_7 = arith.constant 0 : index
    %9 = vector.load %arg4[%c0_6, %c0_7] : memref<128x128xbf16, #tpu.memory_space<vmem>>, vector<128x128xbf16>
    %cst_8 = arith.constant dense<0.000000e+00> : vector<32x128xf32>
    %10 = tpu.matmul %8, %9, %cst_8 {dimension_numbers = #tpu.dot_dimension_numbers<[1], [0], [0], [1], [0, 0, 1, 1], [], []>} : vector<32x128xbf16>, vector<128x128xbf16>, vector<32x128xf32> -> vector<32x128xf32>
    %c0_9 = arith.constant 0 : index
    %c0_10 = arith.constant 0 : index
    %11 = vector.load %arg5[%c0_9, %c0_10] : memref<1x128xf32, #tpu.memory_space<vmem>>, vector<1x128xf32>
    %12 = vector.broadcast %11 : vector<1x128xf32> to vector<32x128xf32>
    %13 = arith.addf %10, %12 : vector<32x128xf32>
    %c0_11 = arith.constant 0 : index
    %c0_12 = arith.constant 0 : index
    %14 = vector.load %arg6[%c0_11, %c0_12] : memref<32x128xf32, #tpu.memory_space<vmem>>, vector<32x128xf32>
    tpu.vector_store %arg6[%c0_11, %c0_12], %13 {strides = array<i32>} : memref<32x128xf32, #tpu.memory_space<vmem>>, vector<32x128xf32>,
    return
  }
  func.func @transform_0(%arg0: i32) -> (i32, i32) {
    %c0_i32 = arith.constant 0 : i32
    %c0_i32_0 = arith.constant 0 : i32
    %c0_i32_1 = arith.constant 0 : i32
    return %c0_i32, %c0_i32_0 : i32, i32
  }
  func.func @transform_1(%arg0: i32) -> (i32, i32) {
    %c0_i32 = arith.constant 0 : i32
    %c0_i32_0 = arith.constant 0 : i32
    %c0_i32_1 = arith.constant 0 : i32
    return %c0_i32, %c0_i32_0 : i32, i32
  }
  func.func @transform_2(%arg0: i32) -> (i32, i32) {
    %c0_i32 = arith.constant 0 : i32
    %c0_i32_0 = arith.constant 0 : i32
    %c0_i32_1 = arith.constant 0 : i32
    return %c0_i32, %c0_i32_0 : i32, i32
  }
  func.func @transform_3(%arg0: i32) -> (i32, i32) {
    %c0_i32 = arith.constant 0 : i32
    %c0_i32_0 = arith.constant 0 : i32
    %c0_i32_1 = arith.constant 0 : i32
    return %c0_i32, %c0_i32_0 : i32, i32
  }
  func.func @transform_4(%arg0: i32) -> (i32, i32) {
    %c0_i32 = arith.constant 0 : i32
    %c0_i32_0 = arith.constant 0 : i32
    %c0_i32_1 = arith.constant 0 : i32
    return %c0_i32, %c0_i32_0 : i32, i32
  }
  func.func @transform_5(%arg0: i32) -> (i32, i32) {
    %c0_i32 = arith.constant 0 : i32
    %c0_i32_0 = arith.constant 0 : i32
    %c0_i32_1 = arith.constant 0 : i32
    return %c0_i32, %c0_i32_0 : i32, i32
  }
}

</mosaic_0001>

<bundles_post_ra>
// kernel: tpu_custom_call.1
= control target key start
LH: loop header
LB: loop body
LE: loop exit
PB: predicated region body
PF: predicated region fallthrough
CT: control target
= control target key end

     0   :  { %10 = vsyncpa [#allocation3], 0  ;;  %s693_s0 = inlined_call_operand.hbm [shape: bf16[32,256], index: 0, kind: input, shape index: {}]   ;;  %s694_s1 = inlined_call_operand.hbm [shape: bf16[256,128], index: 1, kind: input, shape index: {}]   ;;  %s695_s2 = inlined_call_operand.vmem [shape: f32[1,128], index: 2, kind: input, shape index: {}]   ;;  %s696_s3 = inlined_call_operand.hbm [shape: bf16[128,128], index: 3, kind: input, shape index: {}]   ;;  %s697_s4 = inlined_call_operand.vmem [shape: f32[1,128], index: 4, kind: input, shape index: {}]   ;;  %s698_s5 = inlined_call_operand.hbm [shape: f32[32,128], index: 5, kind: output, shape index: {}]  }
   0x1   :  { %11 = vsyncpa [#allocation6], 0 }
   0x2   :  { %12 = vsyncpa [#allocation4], 0  ;;  %s631_s18 = smov [#allocation5]  }
   0x3   :  { %s30_s19 = sshll.u32 %s631_s18, 4  ;;  %s31_s19 = int_to_ptr.vmem [resolvable:$true] %s30_s19 }
   0x4   :  { %s553_s20 = scalar_lea.vmem %s31_s19, 2048  ;;  %p558_p1 = scmp.lt.s32.totalorder %s31_s19, %s31_s19 }
   0x5   :  { %p554_p0 = scmp.ne.s32.totalorder %s31_s19, %s553_s20  ;;  %p559_p2 = scmp.lt.s32.totalorder %s553_s20, %s553_s20 }
   0x7   :  { %p560_p3 = por %p559_p2, %p558_p1 }
   0x9   :  { %p561_p4 = pnand %p560_p3, %p554_p0 }
   0xb   :  { %564 = shalt.err (!%p561_p4)
}
   0xc   :  { %s632_s21 = smov 64   ;;  %s633_s22 = smov 4  }
   0xd   :  { %36 = dma.hbm_to_vmem [thread:$0]  %s694_s1, 2048, %s31_s19, [#allocation6], %s632_s21, %s632_s21, %s633_s22  }
   0xe   :  { %s634_s25 = smov [#allocation2]  }
   0xf   :  { %s18_s26 = sshll.u32 %s634_s25, 4  ;;  %s19_s26 = int_to_ptr.vmem [resolvable:$true] %s18_s26 }
  0x10   :  { %s573_s27 = scalar_lea.vmem %s19_s26, 512  ;;  %p578_p6 = scmp.lt.s32.totalorder %s19_s26, %s19_s26 }
  0x11   :  { %p574_p5 = scmp.ne.s32.totalorder %s19_s26, %s573_s27  ;;  %p579_p7 = scmp.lt.s32.totalorder %s573_s27, %s573_s27 }
  0x13   :  { %p580_p8 = por %p579_p7, %p578_p6 }
  0x15   :  { %p581_p9 = pnand %p580_p8, %p574_p5 }
  0x17   :  { %584 = shalt.err (!%p581_p9)
}
  0x18   :  { %s635_s28 = smov 128   ;;  %s636_s29 = smov 8  }
  0x19   :  { %24 = dma.hbm_to_vmem [thread:$0]  %s693_s0, 512, %s19_s26, [#allocation3], %s635_s28, %s635_s28, %s636_s29  }
  0x1a   :  { %s637_s1 = smov [#allocation7]  }
  0x1b   :  { %s44_s7 = sshll.u32 %s637_s1, 4  ;;  %s45_s7 = int_to_ptr.vmem [resolvable:$true] %s44_s7 }
  0x1c   :  { %s593_s8 = scalar_lea.vmem %s45_s7, 1024  ;;  %p598_p11 = scmp.lt.s32.totalorder %s45_s7, %s45_s7 }
  0x1d   :  { %p594_p10 = scmp.ne.s32.totalorder %s45_s7, %s593_s8  ;;  %p599_p12 = scmp.lt.s32.totalorder %s593_s8, %s593_s8 }
  0x1f   :  { %p600_p13 = por %p599_p12, %p598_p11 }
  0x21   :  { %p601_p0 = pnand %p600_p13, %p594_p10 }
  0x23   :  { %604 = shalt.err (!%p601_p0)
}
  0x24   :  { %50 = dma.hbm_to_vmem [thread:$0]  %s696_s3, 1024, %s45_s7, [#allocation6], %s632_s21, %s632_s21, %s633_s22  }
  0x25   :  { %625 = dma.done.wait [#allocation3], 512  }
  0x26   :  { %626 = vsyncadd [#allocation3], 4294966784 }
  0x27   :  { %627 = dma.done.wait [#allocation6], 3072  }
  0x28   :  { %628 = vsyncadd [#allocation6], 4294964224  ;;  %v515_v0 = vld [vmem:[#allocation5 + $0x78] sm:$0xff]   ;;  %v517_v2 = vld [vmem:[#allocation5 + $0x70] sm:$0xff]   ;;  %s638_s12 = smov [#allocation8]  }
  0x29   :  { %v516_v1 = vld [vmem:[#allocation5 + $0x38] sm:$0xff]   ;;  %449 = vmatprep.subr.bf16.mxu0 %v515_v0  ;;  %v518_v3 = vld [vmem:[#allocation5 + $0x30] sm:$0xff]   ;;  %v519_v4 = vld [vmem:[#allocation5 + $0x68] sm:$0xff]   ;;  %s406_s13 = sshll.u32 %s638_s12, 4  ;;  %s407_s13 = int_to_ptr.vmem [resolvable:$true] %s406_s13 }
  0x2a   :  { %450 = vmatpush3.bf16.msra.mxu0 %v516_v1  ;;  %v520_v5 = vld [vmem:[#allocation5 + $0x28] sm:$0xff]   ;;  %v521_v6 = vld [vmem:[#allocation5 + $0x60] sm:$0xff]   ;;  %v523_v8 = vld [vmem:[#allocation5 + $0x58] sm:$0xff]   ;;  %s605_s14 = scalar_lea.vmem %s407_s13, 512  ;;  %p610_p2 = scmp.lt.s32.totalorder %s407_s13, %s407_s13 }
  0x2b   :  { %451 = vmatprep.subr.bf16.mxu0 %v517_v2  ;;  %v522_v7 = vld [vmem:[#allocation5 + $0x20] sm:$0xff]   ;;  %v524_v9 = vld [vmem:[#allocation5 + $0x18] sm:$0xff]   ;;  %v525_v10 = vld [vmem:[#allocation5 + $0x50] sm:$0xff]   ;;  %p606_p1 = scmp.ne.s32.totalorder %s407_s13, %s605_s14  ;;  %p611_p3 = scmp.lt.s32.totalorder %s605_s14, %s605_s14 }
  0x2c   :  { %v533_v11 = vld [vmem:[#allocation2 + $0x4] ss:$8 sps:$4 sm:$0xff]   ;;  %v526_v12 = vld [vmem:[#allocation5 + $0x10] sm:$0xff]   ;;  %v537_v14 = vld [vmem:[#allocation7 + $0x38] sm:$0xff]  }
  0x2d   :  { %v527_v13 = vld [vmem:[#allocation5 + $0x48] sm:$0xff]   ;;  %254 = vmatprep.mubr.bf16.mxu0 %v533_v11  ;;  %v538_v15 = vld [vmem:[#allocation7 + $0x30] sm:$0xff]   ;;  %487 = vmatprep.subr.bf16.mxu1 %v537_v14  ;;  %v529_v18 = vld [vmem:[#allocation5 + $0x40] sm:$0xff]   ;;  %p612_p4 = por %p611_p3, %p610_p2 }
  0x2e   :  { %452 = vmatpush3.bf16.msra.mxu0 %v518_v3  ;;  %v528_v16 = vld [vmem:[#allocation5 + $0x8] sm:$0xff]   ;;  %488 = vmatpush3.bf16.msra.mxu1 %v537_v14  ;;  %v530_v19 = vld [vmem:[#allocation5] sm:$0xff]   ;;  %v534_v21 = vld [vmem:[#allocation2 + $0x14] ss:$8 sps:$4 sm:$0xff]  }
  0x2f   :  { %453 = vmatprep.subr.bf16.mxu0 %v519_v4  ;;  %v539_v17 = vld [vmem:[#allocation7 + $0x28] sm:$0xff]   ;;  %489 = vmatprep.subr.bf16.mxu1 %v538_v15  ;;  %v536_v22 = vld [vmem:[#allocation2 + $0x10] ss:$8 sps:$4 sm:$0xff]   ;;  %v540_v23 = vld [vmem:[#allocation7 + $0x20] sm:$0xff]   ;;  %p613_p5 = pnand %p612_p4, %p606_p1 }
  0x30   :  { %v531_v20 = vld [vmem:[#allocation2] ss:$8 sps:$4 sm:$0xff]   ;;  %v541_v24 = vld [vmem:[#allocation7 + $0x18] sm:$0xff]   ;;  %v542_v25 = vld [vmem:[#allocation7 + $0x10] sm:$0xff]  }
  0x31   :  { %v543_v26 = vld [vmem:[#allocation7 + $0x8] sm:$0xff]   ;;  %v544_v27 = vld [vmem:[#allocation7] sm:$0xff]  }
  0x32   :  { %454 = vmatpush3.bf16.msra.mxu0 %v520_v5  ;;  %490 = vmatpush3.bf16.msra.mxu1 %v538_v15  ;;  %v419_v32 = vld [vmem:[%s695_s2] ss:$0 sm:$0xff] }
  0x33   :  { %455 = vmatprep.subr.bf16.mxu0 %v521_v6  ;;  %491 = vmatprep.subr.bf16.mxu1 %v539_v17  ;;  %v440_v51 = vld [vmem:[%s697_s4] ss:$0 sm:$0xff] }
  0x36   :  { %456 = vmatpush3.bf16.msra.mxu0 %v522_v7  ;;  %492 = vmatpush3.bf16.msra.mxu1 %v539_v17 }
  0x37   :  { %457 = vmatprep.subr.bf16.mxu0 %v523_v8  ;;  %493 = vmatprep.subr.bf16.mxu1 %v540_v23 }
  0x3a   :  { %458 = vmatpush3.bf16.msra.mxu0 %v524_v9  ;;  %494 = vmatpush3.bf16.msra.mxu1 %v540_v23 }
  0x3b   :  { %459 = vmatprep.subr.bf16.mxu0 %v525_v10  ;;  %495 = vmatprep.subr.bf16.mxu1 %v541_v24 }
  0x3e   :  { %460 = vmatpush3.bf16.msra.mxu0 %v526_v12  ;;  %496 = vmatpush3.bf16.msra.mxu1 %v541_v24 }
  0x3f   :  { %461 = vmatprep.subr.bf16.mxu0 %v527_v13  ;;  %497 = vmatprep.subr.bf16.mxu1 %v542_v25 }
  0x42   :  { %462 = vmatpush3.bf16.msra.mxu0 %v528_v16  ;;  %498 = vmatpush3.bf16.msra.mxu1 %v542_v25 }
  0x43   :  { %463 = vmatprep.subr.bf16.mxu0 %v529_v18  ;;  %499 = vmatprep.subr.bf16.mxu1 %v543_v26 }
  0x46   :  { %464 = vmatpush3.bf16.msra.mxu0 %v530_v19  ;;  %500 = vmatpush3.bf16.msra.mxu1 %v543_v26 }
  0x47   :  { %501 = vmatprep.subr.bf16.mxu1 %v544_v27 }
  0x49   :  { %255 = vmatmul.mubr.bf16.vlgmr.msra.gmra.mxu0 %v531_v20 }
  0x4a   :  { %262 = vmatprep.mubr.bf16.mxu0 %v534_v21  ;;  %502 = vmatpush3.bf16.msra.mxu1 %v544_v27 }
  0x51   :  { %263 = vmatmul.mubr.bf16.gmra.mxu0 %v536_v22 }
 0x109   :  { %v465_v28 = vpop.f32.mrf.mxu0 }
 0x10b   :  { %v466_v29 = vpop.f32.mrf.mxu0 }
 0x10c   :  { %v467_v30 = vadd.f32 %v466_v29, %v465_v28 }
 0x10d   :  { %v468_v31 = vpop.f32.mrf.mxu0 }
 0x10e   :  { %v257_v35 = vadd.f32 %v467_v30, %v419_v32 }
 0x10f   :  { %v469_v33 = vpop.f32.mrf.mxu0 }
 0x110   :  { %v470_v34 = vadd.f32 %v469_v33, %v468_v31  ;;  %v271_v40 = vmax.f32 %v257_v35, 0.0 }
 0x111   :  { %v471_v36 = vpop.f32.mrf.mxu0 }
 0x112   :  { %v260_v37 = vadd.f32 %v470_v34, %v419_v32 }
 0x113   :  { %v472_v38 = vpop.f32.mrf.mxu0 }
 0x114   :  { %v473_v39 = vadd.f32 %v472_v38, %v471_v36  ;;  %v272_v41 = vmax.f32 %v260_v37, 0.0 }
 0x115   :  { %v474_v42 = vpop.f32.mrf.mxu0 }
 0x116   :  { %v275_v43 = vpack.c.bf16 %v272_v41, %v271_v40  ;;  %v265_v45 = vadd.f32 %v473_v39, %v419_v32 }
 0x117   :  { %v475_v44 = vpop.f32.mrf.mxu0 }
 0x118   :  { %v476_v46 = vadd.f32 %v475_v44, %v474_v42  ;;  %503 = vmatprep.mubr.bf16.mxu1 %v275_v43  ;;  %v273_v48 = vmax.f32 %v265_v45, 0.0 }
 0x11a   :  { %v268_v47 = vadd.f32 %v476_v46, %v419_v32 }
 0x11c   :  { %v274_v49 = vmax.f32 %v268_v47, 0.0 }
 0x11e   :  { %v276_v50 = vpack.c.bf16 %v274_v49, %v273_v48 }
 0x120   :  { %504 = vmatmul.mubr.bf16.vlgmr.msra.gmra.mxu1 %v276_v50 }
 0x1e0   :  { %v505_v52 = vpop.f32.mrf.mxu1 }
 0x1e1   :  { %v391_v53 = vadd.f32 %v505_v52, %v440_v51 }
 0x1e2   :  { %v382_v54 = vpop.f32.mrf.mxu1 }
 0x1e3   :  { %399 = vst [vmem:[#allocation8 + $0x10] sm:$0xff] %v391_v53  ;;  %v383_v55 = vadd.f32 %v440_v51, %v382_v54 }
 0x1e4   :  { %v506_v56 = vpop.f32.mrf.mxu1 }
 0x1e5   :  { %397 = vst [vmem:[#allocation8] sm:$0xff] %v383_v55  ;;  %v394_v57 = vadd.f32 %v506_v56, %v440_v51 }
 0x1e6   :  { %v385_v58 = vpop.f32.mrf.mxu1 }
 0x1e7   :  { %400 = vst [vmem:[#allocation8 + $0x18] sm:$0xff] %v394_v57  ;;  %v386_v59 = vadd.f32 %v440_v51, %v385_v58 }
 0x1e9   :  { %398 = vst [vmem:[#allocation8 + $0x8] sm:$0xff] %v386_v59 }
 0x1ea   :  { %616 = shalt.err (!%p613_p5)
}
 0x1eb   :  { %412 = dma.vmem_to_hbm [thread:$0]  %s407_s13, 512, %s698_s5, [#allocation4], %s635_s28, %s635_s28, %s636_s29  }
 0x1ec   :  { %629 = dma.done.wait [#allocation4], 512  }
 0x1ed   :  { %630 = vsyncadd [#allocation4], 4294966784 }
 0x1ee   :  { %416 = vsyncpa [#allocation3], 1 }
 0x1ef   :  { %417 = vsyncpa [#allocation6], 1 }
 0x1f0   :  { %418 = vsyncpa [#allocation4], 1 }

</bundles_post_ra>
